<compile_context>
chip_gen: v6e
topology: v6e:2x2x1
jax: 0.10.0
libtpu: 0.0.40
codegen_flags: <defaults>
</compile_context>

<pallas_src>
import numpy as np
import jax
import jax.numpy as jnp
from jax import lax
from jax.experimental import pallas as pl
from jax.experimental.pallas import tpu as pltpu


LANE = 128       # lane width (last-dim tiling unit)
SUBLANE = 8      # sublane width (second-last-dim tiling unit)
MIN_TILE = 256   # smallest node-axis tile once N is large enough
MAX_TILE = 1024  # largest node-axis tile we ever try


def _round_up(x, m):
    return ((x + m - 1) // m) * m


def _pad2(a, rows, cols):
    r, c = a.shape
    return jnp.pad(a, ((0, rows - r), (0, cols - c)))


def _vmem_limit_bytes():
    """Generation-aware VMEM limit (v5e/v6e: 128 MiB physical, v7x: 64 MiB)."""
    cap = 64 * 1024 * 1024  # conservative (v7x-sized) fallback
    try:
        info = pltpu.get_tpu_info()
        cap = int(getattr(info, "vmem_capacity_bytes", cap) or cap)
    except Exception:
        pass
    return int(min(cap * 3 // 4, 100 * 1024 * 1024))


def _max_node_tile(dpad, vmem_limit):
    """Largest square node tile whose agg-kernel working set fits the budget."""
    budget = vmem_limit // 2  # headroom for Mosaic internal scratch
    t = MAX_TILE
    while t > MIN_TILE:
        # double-buffered: bf16 W tile + bf16 YH tile + f32 agg_in + f32 out
        need = 2 * (t * t * 2) + 2 * t * dpad * (2 + 4 + 4)
        if need <= budget:
            return t
        t //= 2
    return t


def _padded_n_and_tile(n, max_tile):
    """Padded node count + node-axis tile (always a legal (8,128)/full block)."""
    n8 = _round_up(n, SUBLANE)
    if n8 < 2 * MIN_TILE:
        return n8, n8                                   # one full-extent block
    tile = max_tile
    # keep >=2 blocks on the node axis (2-TC sharding on v7x) and cap padding
    while tile > MIN_TILE and (n8 < 2 * tile or
                               _round_up(n8, tile) - n8 > tile // 2):
        tile //= 2
    return _round_up(n8, tile), tile


def _tile_sparsity(w, npad_src, npad_dst, tn_src, tn_dst):
    """Per dst-tile compacted list of nonzero src-tile indices.

    Returns (colmap_flat [ndt*max_nnz] i32, nnz [ndt] i32, max_nnz).
    Padded entries repeat the last valid index (repeated block index => no
    extra DMA).  Falls back to the dense schedule if `w` is traced.
    """
    nst, ndt = npad_src // tn_src, npad_dst // tn_dst
    try:
        wm = np.asarray(w) != 0.0
    except Exception:  # wrapper under jit: dense fallback, no sparsity skip
        colmap = jnp.tile(jnp.arange(nst, dtype=jnp.int32), ndt)
        return colmap, jnp.full((ndt,), nst, jnp.int32), nst
    wm = np.pad(wm, ((0, npad_src - wm.shape[0]), (0, npad_dst - wm.shape[1])))
    blk = wm.reshape(nst, tn_src, ndt, tn_dst).any(axis=(1, 3))  # [nst, ndt]
    cols = [np.nonzero(blk[:, i])[0].astype(np.int32) for i in range(ndt)]
    nnz = np.array([len(c) for c in cols], np.int32)
    max_nnz = max(int(nnz.max()), 1)
    colmap = np.zeros((ndt, max_nnz), np.int32)
    for i, c in enumerate(cols):
        if len(c):
            colmap[i, :len(c)] = c
            colmap[i, len(c):] = c[-1]
    return jnp.asarray(colmap.reshape(-1)), jnp.asarray(nnz), max_nnz


# ----------------------------------------------------------------------------
# Kernel 1: per canonical edge type (YH precomputed in the wrapper)
#   agg_out = (agg_in or 0) + W^T @ YH       (reduction over nonzero src tiles)
# Grid: (dst_tiles, max_nnz_src_tiles); src axis last ("arbitrary"), the
# output block is a resident accumulator; agg_in is aliased to the output.
# ----------------------------------------------------------------------------
def _make_agg_kernel(accumulate):
    def _accum(w_ref, yh_ref, out_ref):
        out_ref[...] += lax.dot_general(
            w_ref[...], yh_ref[...],
            dimension_numbers=(((0,), (0,)), ((), ())),   # contract W's src dim
            preferred_element_type=jnp.float32)

    if accumulate:
        def kernel(colmap_ref, nnz_ref, agg_in_ref, w_ref, yh_ref, out_ref):
            i, j = pl.program_id(0), pl.program_id(1)

            @pl.when(j == 0)
            def _():
                out_ref[...] = agg_in_ref[...]

            @pl.when(j < nnz_ref[i])
            def _():
                _accum(w_ref, yh_ref, out_ref)
        return kernel

    def kernel(colmap_ref, nnz_ref, w_ref, yh_ref, out_ref):
        i, j = pl.program_id(0), pl.program_id(1)

        @pl.when(j == 0)
        def _():
            out_ref[...] = jnp.zeros_like(out_ref)

        @pl.when(j < nnz_ref[i])
        def _():
            _accum(w_ref, yh_ref, out_ref)
    return kernel


def etype_agg(w_bf16, yh_bf16, agg_in, colmap, nnz, max_nnz, *,
              tn_src, tn_dst, vmem_limit):
    n_src, n_dst = w_bf16.shape
    dpad = yh_bf16.shape[1]
    ndt = n_dst // tn_dst
    grid = (ndt, max_nnz)

    # index_maps receive the scalar-prefetch refs as trailing positional args.
    w_map = lambda i, j, colmap, nnz: (colmap[i * max_nnz + j], i)
    yh_map = lambda i, j, colmap, nnz: (colmap[i * max_nnz + j], 0)
    io_map = lambda i, j, colmap, nnz: (i, 0)

    w_spec = pl.BlockSpec((tn_src, tn_dst), w_map)
    yh_spec = pl.BlockSpec((tn_src, dpad), yh_map)
    out_spec = pl.BlockSpec((tn_dst, dpad), io_map)

    if agg_in is None:
        kernel = _make_agg_kernel(False)
        in_specs = [w_spec, yh_spec]
        operands = (colmap, nnz, w_bf16, yh_bf16)
        aliases = {}
    else:
        kernel = _make_agg_kernel(True)
        in_specs = [pl.BlockSpec((tn_dst, dpad), io_map), w_spec, yh_spec]
        operands = (colmap, nnz, agg_in, w_bf16, yh_bf16)
        # input index counts the 2 scalar-prefetch operands -> agg_in is 2
        aliases = {2: 0}

    steps = ndt * max_nnz
    flops = int(2 * steps * tn_src * tn_dst * dpad)
    bytes_acc = int(steps * (tn_src * tn_dst * 2 + tn_src * dpad * 2)
                    + (2 if agg_in is not None else 1) * n_dst * dpad * 4)

    return pl.pallas_call(
        kernel,
        grid_spec=pltpu.PrefetchScalarGridSpec(
            num_scalar_prefetch=2,
            grid=grid,
            in_specs=in_specs,
            out_specs=out_spec,
        ),
        out_shape=jax.ShapeDtypeStruct((n_dst, dpad), jnp.float32),
        input_output_aliases=aliases,
        compiler_params=pltpu.CompilerParams(
            dimension_semantics=("parallel", "arbitrary"),
            vmem_limit_bytes=vmem_limit),
        cost_estimate=pl.CostEstimate(flops=flops, transcendentals=0,
                                      bytes_accessed=bytes_acc),
    )(*operands)


# ----------------------------------------------------------------------------
# Kernel 2: per node type fused epilogue (neg + combine + relu)
#   acc = agg + X - sum_k Dpt_k * (Y @ HHT_k)     (one wide MXU pass over k)
#   ret = relu( (1-alp)*Y + alp*lam / (1 + lam*deg) * acc )
# ----------------------------------------------------------------------------
def _make_combine_kernel(k_src, dpad, alp, lam):
    alp = float(alp)
    lam = float(lam)

    def kernel(y_ref, x_ref, agg_ref, deg_ref, dpt_ref, hhts_ref, o_ref):
        y = y_ref[...]
        # single (tn, dpad) x (dpad, k_src*dpad) matmul covering every HHT_k
        neg_all = jnp.dot(y, hhts_ref[...], preferred_element_type=jnp.float32)
        dpt = dpt_ref[...]
        acc = agg_ref[...] + x_ref[...]
        for k in range(k_src):  # tiny static unroll (k_src is small)
            acc = acc - dpt[:, k:k + 1] * neg_all[:, k * dpad:(k + 1) * dpad]
        scale = (alp * lam) / (1.0 + lam * deg_ref[...])  # exact; DMA-bound
        o_ref[...] = jnp.maximum((1.0 - alp) * y + scale * acc, 0.0)

    return kernel


def combine(y, x, agg, deg, dpt_mat, hhts, *, alp, lam, tn, vmem_limit):
    n, dpad = y.shape
    k_src = dpt_mat.shape[1]
    grid = (n // tn,)

    flops = int(2 * n * dpad * (k_src * dpad) + 10 * n * dpad)
    bytes_acc = int(4 * n * dpad * 4 + n * (1 + k_src) * 4
                    + k_src * dpad * dpad * 4)

    # TODO(synk): for very large dpad (>= ~2048) tile the (dpad, k*dpad) HHT
    # operand instead of keeping it resident (v7x has only 64 MiB VMEM).
    return pl.pallas_call(
        _make_combine_kernel(k_src, dpad, alp, lam),
        grid_spec=pltpu.PrefetchScalarGridSpec(
            num_scalar_prefetch=0,
            grid=grid,
            in_specs=[
                pl.BlockSpec((tn, dpad), lambda i: (i, 0)),            # Y
                pl.BlockSpec((tn, dpad), lambda i: (i, 0)),            # X
                pl.BlockSpec((tn, dpad), lambda i: (i, 0)),            # agg
                pl.BlockSpec((tn, 1), lambda i: (i, 0)),               # deg
                pl.BlockSpec((tn, k_src), lambda i: (i, 0)),           # Dpt
                pl.BlockSpec((dpad, k_src * dpad), lambda i: (0, 0)),  # HHTs
            ],
            out_specs=pl.BlockSpec((tn, dpad), lambda i: (i, 0)),
        ),
        out_shape=jax.ShapeDtypeStruct((n, dpad), jnp.float32),
        compiler_params=pltpu.CompilerParams(
            dimension_semantics=("parallel",),
            vmem_limit_bytes=vmem_limit),
        cost_estimate=pl.CostEstimate(flops=flops, transcendentals=0,
                                      bytes_accessed=bytes_acc),
    )(y, x, agg, deg, dpt_mat, hhts)


# ----------------------------------------------------------------------------
# Wrapper reproducing Propagate.forward
#   g is a plain dict:
#     g["ntypes"]  : {ntype: N}
#     g["adj"]     : {(src, rel, dst): dense weighted adjacency [N_src, N_dst]}
#     g["out_deg"] : {(src, rel, dst): out-degree of src nodes [N_src, 1]}
#     g["deg"]     : {ntype: node data 'deg' [N, 1]}
#   alp / lam are Python scalars (as in the PyTorch call) and are baked in.
# ----------------------------------------------------------------------------
def propagate(g, C, Y, X, H, alp, lam, etypes_inv):
    del C  # unused by the reference forward pass as well
    f32 = jnp.float32
    hi = lax.Precision.HIGHEST

    ntypes = g["ntypes"]
    d = next(iter(Y.values())).shape[1]
    dpad = _round_up(d, LANE)

    vmem_limit = _vmem_limit_bytes()
    max_tile = _max_node_tile(dpad, vmem_limit)

    npad, tile = {}, {}
    for nt, n in ntypes.items():
        npad[nt], tile[nt] = _padded_n_and_tile(n, max_tile)

    y_pad = {nt: _pad2(jnp.asarray(Y[nt], f32), npad[nt], dpad) for nt in ntypes}
    x_pad = {nt: _pad2(jnp.asarray(X[nt], f32), npad[nt], dpad) for nt in ntypes}
    deg_pad = {nt: _pad2(jnp.asarray(g["deg"][nt], f32), npad[nt], 1)
               for nt in ntypes}
    h_pad = {t: _pad2(jnp.asarray(h, f32), dpad, dpad) for t, h in H.items()}

    agg = {nt: None for nt in ntypes}
    dpt_lists = {nt: [] for nt in ntypes}
    hht_lists = {nt: [] for nt in ntypes}

    for etype, w in g["adj"].items():
        src, rel, dst = etype
        t = src + '-' + rel + '-' + dst
        si, ri, di = etypes_inv[etype]
        t_inv = si + '-' + ri + '-' + di
        ht, htinv = h_pad[t], h_pad[t_inv]

        # Tiny DxD ops hoisted out of the tiled kernels (computed once).
        hsum = ht + htinv.T
        hht = jnp.matmul(ht, ht.T, precision=hi)

        # YH precompute: (W^T Y) Hsum == W^T (Y Hsum); the agg kernel is then
        # one bf16 accumulation per tile pair (no per-dst-tile epilogue).
        yh = jnp.matmul(y_pad[src], hsum, precision=hi).astype(jnp.bfloat16)

        # W: bf16 cast + pad only — NO wrapper transpose (kernel contracts
        # W's first dim on the MXU).
        # TODO(synk): cache the preprocessed bf16 W / tile map across calls
        # (they depend only on the static graph); optionally fp8 W on v7x.
        w_bf = _pad2(jnp.asarray(w, f32).astype(jnp.bfloat16),
                     npad[src], npad[dst])

        colmap, nnz, max_nnz = _tile_sparsity(w, npad[src], npad[dst],
                                              tile[src], tile[dst])

        agg[dst] = etype_agg(w_bf, yh, agg[dst], colmap, nnz, max_nnz,
                             tn_src=tile[src], tn_dst=tile[dst],
                             vmem_limit=vmem_limit)

        dpt_lists[src].append(_pad2(jnp.asarray(g["out_deg"][etype], f32),
                                    npad[src], 1))
        hht_lists[src].append(hht)

    ret = {}
    for nt, n in ntypes.items():
        agg_nt = (agg[nt] if agg[nt] is not None
                  else jnp.zeros((npad[nt], dpad), f32))
        if dpt_lists[nt]:
            dpt_mat = jnp.concatenate(dpt_lists[nt], axis=1)   # [N, k_src]
            hhts = jnp.concatenate(hht_lists[nt], axis=1)      # [D, k_src*D]
        else:  # ntype with no outgoing etype: zero neg contribution
            dpt_mat = jnp.zeros((npad[nt], 1), f32)
            hhts = jnp.zeros((dpad, dpad), f32)
        out_pad = combine(y_pad[nt], x_pad[nt], agg_nt, deg_pad[nt],
                          dpt_mat, hhts, alp=alp, lam=lam,
                          tn=tile[nt], vmem_limit=vmem_limit)
        ret[nt] = out_pad[:n, :d]
    return ret


# Pure-JAX f32 reference (mirrors the PyTorch/DGL semantics) for verification.
def propagate_ref(g, C, Y, X, H, alp, lam, etypes_inv):
    del C
    hi = lax.Precision.HIGHEST
    neg = {nt: jnp.zeros_like(Y[nt]) for nt in g["ntypes"]}
    agg = {nt: jnp.zeros_like(Y[nt]) for nt in g["ntypes"]}
    for etype, w in g["adj"].items():
        src, rel, dst = etype
        t = src + '-' + rel + '-' + dst
        si, ri, di = etypes_inv[etype]
        t_inv = si + '-' + ri + '-' + di
        ht, htinv = H[t], H[t_inv]
        hht = jnp.matmul(ht, ht.T, precision=hi)
        neg[src] = neg[src] + g["out_deg"][etype] * jnp.matmul(Y[src], hht,
                                                               precision=hi)
        msg = jnp.matmul(w.T, Y[src], precision=hi)
        agg[dst] = agg[dst] + jnp.matmul(msg, ht + htinv.T, precision=hi)
    out = {}
    for nt in g["ntypes"]:
        r = agg[nt] + X[nt] - neg[nt]
        r = (1.0 - alp) * Y[nt] + alp * lam * (
            1.0 / (1.0 + lam * g["deg"][nt])) * r
        out[nt] = jnp.maximum(r, 0.0)
    return out


if __name__ == "__main__":
    key = jax.random.PRNGKey(0)
    N_U, N_I, D = 48, 40, 96
    alp, lam = 0.1, 1.0

    ntypes = {"user": N_U, "item": N_I}
    etypes = [("user", "buys", "item"),
              ("item", "bought_by", "user"),
              ("user", "follows", "user"),       # extra relations so several
              ("user", "followed_by", "user")]   # etypes hit the same dst
    etypes_inv = {etypes[0]: etypes[1], etypes[1]: etypes[0],
                  etypes[2]: etypes[3], etypes[3]: etypes[2]}

    keys = jax.random.split(key, 16)
    Y = {"user": jax.random.normal(keys[0], (N_U, D), jnp.float32),
         "item": jax.random.normal(keys[1], (N_I, D), jnp.float32)}
    X = {"user": jax.random.normal(keys[2], (N_U, D), jnp.float32),
         "item": jax.random.normal(keys[3], (N_I, D), jnp.float32)}
    C = None  # unused by the forward pass

    H = {}
    for k, (s, r, dst) in enumerate(etypes):
        H[s + '-' + r + '-' + dst] = 0.1 * jax.random.normal(
            keys[4 + k], (D, D), jnp.float32)

    # Dense weighted adjacencies (edge weight 'w'), sparsified with a mask.
    def make_adj(kmask, kw, n_src, n_dst):
        mask = (jax.random.uniform(kmask, (n_src, n_dst)) < 0.3)
        wts = jax.random.uniform(kw, (n_src, n_dst), jnp.float32, 0.1, 1.0)
        return jnp.where(mask, wts, 0.0).astype(jnp.float32)

    adj = {}
    for k, (s, r, dst) in enumerate(etypes):
        adj[(s, r, dst)] = make_adj(keys[8 + 2 * k], keys[9 + 2 * k],
                                    ntypes[s], ntypes[dst])

    # out_degrees per etype (outgoing edges per src node), [N_src, 1]
    out_deg = {et: jnp.sum((w != 0.0).astype(jnp.float32), axis=1,
                           keepdims=True)
               for et, w in adj.items()}

    # node data 'deg': total degree, [N, 1]
    deg = {nt: jnp.zeros((n, 1), jnp.float32) for nt, n in ntypes.items()}
    for (src, rel, dst), w in adj.items():
        cnt = (w != 0.0).astype(jnp.float32)
        deg[src] = deg[src] + jnp.sum(cnt, axis=1, keepdims=True)
        deg[dst] = deg[dst] + jnp.sum(cnt, axis=0, keepdims=True).T

    g = {"ntypes": ntypes, "adj": adj, "out_deg": out_deg, "deg": deg}

    out = propagate(g, C, Y, X, H, alp, lam, etypes_inv)
    out = {k: jax.block_until_ready(v) for k, v in out.items()}

    ref = propagate_ref(g, C, Y, X, H, alp, lam, etypes_inv)
    for nt in ntypes:
        assert out[nt].shape == Y[nt].shape and out[nt].dtype == jnp.float32
        err = float(jnp.max(jnp.abs(out[nt] - ref[nt])))
        # bf16 W/YH feed with f32 accumulation; errors are further damped by
        # the alp*lam/(1+lam*deg) scale -> well within 5e-3 of exact f32.
        assert jnp.allclose(out[nt], ref[nt], rtol=5e-3, atol=5e-3), (nt, err)

    print("KERNEL_OK")
</pallas_src>

<mosaic_0001>
module attributes {stable_mosaic.version = 11 : i64} {
  func.func @kernel(%arg0: i32, %arg1: i32, %arg2: memref<1xi32, #tpu.memory_space<smem>>, %arg3: memref<1xi32, #tpu.memory_space<smem>>, %arg4: memref<48x40xbf16, #tpu.memory_space<vmem>>, %arg5: memref<48x128xbf16, #tpu.memory_space<vmem>>, %arg6: memref<40x128xf32, #tpu.memory_space<vmem>>) attributes {dimension_semantics = [#tpu.dimension_semantics<parallel>, #tpu.dimension_semantics<arbitrary>], iteration_bounds = array<i64: 1, 1>, scalar_prefetch = 2 : i64, scratch_operands = 0 : i64, tpu.core_type = #tpu.core_type<tc>, window_params = [{transform_indices = @transform_0, window_bounds = array<i64: 48, 40>}, {transform_indices = @transform_1, window_bounds = array<i64: 48, 128>}, {transform_indices = @transform_2, window_bounds = array<i64: 40, 128>}]} {
    %c0_i32 = arith.constant 0 : i32
    %0 = arith.cmpi eq, %arg1, %c0_i32 : i32
    %1 = arith.extui %0 : i1 to i32
    %c0_i32_0 = arith.constant 0 : i32
    %2 = arith.cmpi ne, %1, %c0_i32_0 : i32
    scf.if %2 {
      %cst = arith.constant 0.000000e+00 : f32
      %8 = vector.broadcast %cst : f32 to vector<40x128xf32>
      %c0 = arith.constant 0 : index
      %c0_2 = arith.constant 0 : index
      %9 = vector.load %arg6[%c0, %c0_2] : memref<40x128xf32, #tpu.memory_space<vmem>>, vector<40x128xf32>
      tpu.vector_store %arg6[%c0, %c0_2], %8 {strides = array<i32>} : memref<40x128xf32, #tpu.memory_space<vmem>>, vector<40x128xf32>,
    } else {
    }
    %3 = arith.index_cast %arg0 : i32 to index
    %4 = memref.load %arg3[%3] : memref<1xi32, #tpu.memory_space<smem>>
    %5 = arith.cmpi slt, %arg1, %4 : i32
    %6 = arith.extui %5 : i1 to i32
    %c0_i32_1 = arith.constant 0 : i32
    %7 = arith.cmpi ne, %6, %c0_i32_1 : i32
    scf.if %7 {
      %c0 = arith.constant 0 : index
      %c0_2 = arith.constant 0 : index
      %8 = vector.load %arg6[%c0, %c0_2] : memref<40x128xf32, #tpu.memory_space<vmem>>, vector<40x128xf32>
      %c0_3 = arith.constant 0 : index
      %c0_4 = arith.constant 0 : index
      %9 = vector.load %arg4[%c0_3, %c0_4] : memref<48x40xbf16, #tpu.memory_space<vmem>>, vector<48x40xbf16>
      %c0_5 = arith.constant 0 : index
      %c0_6 = arith.constant 0 : index
      %10 = vector.load %arg5[%c0_5, %c0_6] : memref<48x128xbf16, #tpu.memory_space<vmem>>, vector<48x128xbf16>
      %cst = arith.constant dense<0.000000e+00> : vector<40x128xf32>
      %11 = tpu.matmul %9, %10, %cst {dimension_numbers = #tpu.dot_dimension_numbers<[0], [0], [1], [1], [0, 1, 1, 1], [], []>} : vector<48x40xbf16>, vector<48x128xbf16>, vector<40x128xf32> -> vector<40x128xf32>
      %12 = arith.addf %8, %11 : vector<40x128xf32>
      %c0_7 = arith.constant 0 : index
      %c0_8 = arith.constant 0 : index
      %13 = vector.load %arg6[%c0_7, %c0_8] : memref<40x128xf32, #tpu.memory_space<vmem>>, vector<40x128xf32>
      tpu.vector_store %arg6[%c0_7, %c0_8], %12 {strides = array<i32>} : memref<40x128xf32, #tpu.memory_space<vmem>>, vector<40x128xf32>,
    } else {
    }
    return
  }
  func.func @transform_0(%arg0: i32, %arg1: i32, %arg2: memref<1xi32, #tpu.memory_space<smem>>, %arg3: memref<1xi32, #tpu.memory_space<smem>>) -> (i32, i32) {
    %c1_i32 = arith.constant 1 : i32
    %0 = arith.muli %arg0, %c1_i32 : i32
    %1 = arith.addi %0, %arg1 : i32
    %2 = arith.index_cast %1 : i32 to index
    %3 = memref.load %arg2[%2] : memref<1xi32, #tpu.memory_space<smem>>
    %c0_i32 = arith.constant 0 : i32
    return %3, %arg0 : i32, i32
  }
  func.func @transform_1(%arg0: i32, %arg1: i32, %arg2: memref<1xi32, #tpu.memory_space<smem>>, %arg3: memref<1xi32, #tpu.memory_space<smem>>) -> (i32, i32) {
    %c1_i32 = arith.constant 1 : i32
    %0 = arith.muli %arg0, %c1_i32 : i32
    %1 = arith.addi %0, %arg1 : i32
    %2 = arith.index_cast %1 : i32 to index
    %3 = memref.load %arg2[%2] : memref<1xi32, #tpu.memory_space<smem>>
    %c0_i32 = arith.constant 0 : i32
    %c0_i32_0 = arith.constant 0 : i32
    return %3, %c0_i32 : i32, i32
  }
  func.func @transform_2(%arg0: i32, %arg1: i32, %arg2: memref<1xi32, #tpu.memory_space<smem>>, %arg3: memref<1xi32, #tpu.memory_space<smem>>) -> (i32, i32) {
    %c0_i32 = arith.constant 0 : i32
    %c0_i32_0 = arith.constant 0 : i32
    return %arg0, %c0_i32 : i32, i32
  }
}

</mosaic_0001>

<bundles_post_ra>
// kernel: tpu_custom_call.1
= control target key start
LH: loop header
LB: loop body
LE: loop exit
PB: predicated region body
PF: predicated region fallthrough
CT: control target
= control target key end

     0   :  { %11 = vsyncpa [#allocation6], 0  ;;  %v336_v0 = vmov 0.0   ;;  %s385_s0 = inlined_call_operand.<no memory space> [shape: s32[1], index: 0, kind: input, shape index: {}]   ;;  %s386_s1 = inlined_call_operand.<no memory space> [shape: s32[1], index: 1, kind: input, shape index: {}]   ;;  %s387_s2 = inlined_call_operand.vmem [shape: bf16[48,40], index: 2, kind: input, shape index: {}]   ;;  %s388_s3 = inlined_call_operand.vmem [shape: bf16[48,128], index: 3, kind: input, shape index: {}]   ;;  %s389_s4 = inlined_call_operand.hbm [shape: f32[40,128], index: 4, kind: output, shape index: {}]  }
   0x1   :  { %s52_s17 = smul.u32 6, %s385_s0  ;;  %75 = vst [vmem:[#allocation5] sm:$0xff] %v336_v0  ;;  %76 = vst [vmem:[#allocation5 + $0x8] sm:$0xff] %v336_v0  ;;  %p261_p1 = scmp.le.s32.totalorder %s386_s1, 0 }
   0x2   :  { %77 = vst [vmem:[#allocation5 + $0x10] sm:$0xff] %v336_v0  ;;  %78 = vst [vmem:[#allocation5 + $0x18] sm:$0xff] %v336_v0 }
   0x3   :  { %79 = vst [vmem:[#allocation5 + $0x20] sm:$0xff] %v336_v0  ;;  %p53_p0 = scmp.lt.s32.totalorder %s52_s17, 5  ;;  %84 = sbr.rel (%p261_p1) target bundleno = 319 (0x13f), region = 17 }
   0x5   :  { %s391_s17 = smov (!%p53_p0, %s52_s17), 5 }
   0x6   :  { %s258_s18 = sshll.u32 %s391_s17, 2 }
   0x7   :  { %s56_s21 = scalar_lea.vmem %s387_s2, %s258_s18  ;;  %s66_s24 = scalar_lea.vmem %s388_s3, %s258_s18 }
   0x8   :  { %v308_v1 = vld [vmem:[%s56_s21] sm:$0xff]   ;;  %v309_v2 = vld [vmem:[%s56_s21 + $0x8] sm:$0xff]   ;;  %v337_v3 = vmov 0.0   ;;  %v311_v4 = vld [vmem:[%s66_s24 + $0x10] sm:$0xff]   ;;  %vm338_vm0 = vmmov 0   ;;  %vm154_vm1 = vcmask 392192  }
   0x9   :  { %120 = vxpose.xlu0.c.b16.start [1/3] (short) (narrow) %v308_v1, 48  ;;  %277 = vmatprep.subr.bf16.mxu0 %v337_v3  ;;  %v312_v5 = vld [vmem:[%s66_s24 + $0x8] sm:$0xff]   ;;  %v310_v6 = vld [vmem:[%s56_s21 + $0x10] sm:$0xff]   ;;  %v313_v7 = vld [vmem:[%s66_s24] sm:$0xff]  }
   0xa   :  { %295 = vmatprep.subr.bf16.mxu1 %v337_v3  ;;  %283 = vmatprep.mubr.msk.bf16.mxu0 %vm338_vm0, %v337_v3  ;;  %v85_v11 = vld [vmem:[#allocation5] sm:$0xff]  ;;  %v86_v15 = vld [vmem:[#allocation5 + $0x8] sm:$0xff]  ;;  %v87_v16 = vld [vmem:[#allocation5 + $0x10] sm:$0xff] }
   0xb   :  { %287 = vmatprep.mubr.msk.bf16.mxu1 %vm338_vm0, %v337_v3  ;;  %278 = vmatpush3.bf16.msra.mxu0 %v311_v4  ;;  %v88_v23 = vld [vmem:[#allocation5 + $0x18] sm:$0xff]  ;;  %v89_v27 = vld [vmem:[#allocation5 + $0x20] sm:$0xff] }
   0xc   :  { %298 = vmatpush3.bf16.msra.mxu1 %v311_v4  ;;  %279 = vmatprep.subr.bf16.mxu0 %v337_v3 }
   0xd   :  { %121 = vxpose.xlu0.c.b16.cont [2/3] (short) (narrow) %v309_v2, 48  ;;  %296 = vmatprep.subr.bf16.mxu1 %v337_v3 }
   0xf   :  { %280 = vmatpush3.bf16.msra.mxu0 %v312_v5 }
  0x10   :  { %299 = vmatpush3.bf16.msra.mxu1 %v312_v5  ;;  %281 = vmatprep.subr.bf16.mxu0 %v337_v3 }
  0x11   :  { %122 = vxpose.xlu0.c.b16.end [3/3] (short) (narrow) %v310_v6, 48  ;;  %297 = vmatprep.subr.bf16.mxu1 %v337_v3 }
  0x13   :  { %282 = vmatpush3.bf16.msra.mxu0 %v313_v7 }
  0x14   :  { %300 = vmatpush3.bf16.msra.mxu1 %v313_v7 }
  0x6b   :  { %v128_v8 = vpop.trf.xlu0 }
  0x6c   :  { %284 = vmatmul.mubr.msk.bf16.vlgmr.msra.gmra.mxu0 %vm154_vm1, %v128_v8 }
  0x6f   :  { %v129_v9 = vpop.trf.xlu0 }
  0x70   :  { %288 = vmatmul.mubr.msk.bf16.vlgmr.msra.gmra.mxu1 %vm154_vm1, %v129_v9 }
  0x71   :  { %291 = vmatprep.mubr.msk.bf16.mxu1 %vm338_vm0, %v337_v3 }
  0x73   :  { %v130_v10 = vpop.trf.xlu0 }
  0x78   :  { %292 = vmatmul.mubr.msk.bf16.gmra.mxu1 %vm154_vm1, %v130_v10 }
 0x12c   :  { %v198_v12 = vpop.f32.mrf.mxu0 }
 0x12d   :  { %v220_v13 = vadd.f32 %v198_v12, %v85_v11 }
 0x12e   :  { %v285_v14 = vpop.f32.mrf.mxu0 }
 0x12f   :  { %225 = vst [vmem:[#allocation5] sm:$0xff] %v220_v13 }
 0x130   :  { %v201_v17 = vpop.f32.mrf.mxu0  ;;  %v206_v18 = vpop.f32.mrf.mxu1 }
 0x131   :  { %v221_v19 = vadd.f32 %v201_v17, %v86_v15  ;;  %v222_v20 = vadd.f32 %v206_v18, %v87_v16 }
 0x132   :  { %v286_v21 = vpop.f32.mrf.mxu0  ;;  %v289_v22 = vpop.f32.mrf.mxu1 }
 0x133   :  { %226 = vst [vmem:[#allocation5 + $0x8] sm:$0xff] %v221_v19  ;;  %227 = vst [vmem:[#allocation5 + $0x10] sm:$0xff] %v222_v20 }
 0x134   :  { %v209_v24 = vpop.f32.mrf.mxu1 }
 0x135   :  { %v223_v25 = vadd.f32 %v209_v24, %v88_v23 }
 0x136   :  { %v290_v26 = vpop.f32.mrf.mxu1 }
 0x137   :  { %228 = vst [vmem:[#allocation5 + $0x18] sm:$0xff] %v223_v25 }
 0x138   :  { %v214_v28 = vpop.f32.mrf.mxu1 }
 0x139   :  { %v224_v29 = vadd.f32 %v214_v28, %v89_v27 }
 0x13a   :  { %v293_v30 = vpop.f32.mrf.mxu1 }
 0x13b   :  { %229 = vst [vmem:[#allocation5 + $0x20] sm:$0xff] %v224_v29 }
 0x13c   :  { %v217_v31 = vpop.f32.mrf.mxu1 }
 0x13e   :  { %v294_v32 = vpop.f32.mrf.mxu1 }
 0x13f PF:  { %s339_s0 = smov [#allocation5]  }
 0x140   :  { %s235_s1 = sshll.u32 %s339_s0, 4  ;;  %s236_s1 = int_to_ptr.vmem [resolvable:$true] %s235_s1 }
 0x141   :  { %s314_s2 = scalar_lea.vmem %s236_s1, 640  ;;  %p319_p3 = scmp.lt.s32.totalorder %s236_s1, %s236_s1 }
 0x142   :  { %p315_p2 = scmp.ne.s32.totalorder %s236_s1, %s314_s2  ;;  %p320_p4 = scmp.lt.s32.totalorder %s314_s2, %s314_s2 }
 0x144   :  { %p321_p5 = por %p320_p4, %p319_p3 }
 0x146   :  { %p322_p6 = pnand %p321_p5, %p315_p2 }
 0x148   :  { %325 = shalt.err (!%p322_p6)
}
 0x149   :  { %s340_s3 = smov 128   ;;  %s341_s27 = smov 8  }
 0x14a   :  { %241 = dma.vmem_to_hbm [thread:$0]  %s236_s1, 640, %s389_s4, [#allocation6], %s340_s3, %s340_s3, %s341_s27  }
 0x14b   :  { %334 = dma.done.wait [#allocation6], 640  }
 0x14c   :  { %335 = vsyncadd [#allocation6], 4294966656 }
 0x14d   :  { %245 = vsyncpa [#allocation6], 1 }

</bundles_post_ra>
